<compile_context>
chip_gen: v6e
topology: v6e:2x2x1
jax: 0.10.0
libtpu: 0.0.40
codegen_flags: <defaults>
</compile_context>

<pallas_src>
import jax
import jax.numpy as jnp
from jax import lax
from jax.experimental import pallas as pl
from jax.experimental.pallas import tpu as pltpu

BN_EPS = 1e-5


# ----------------------------- Pallas kernel ------------------------------- #

def _fused_decoder_kernel(x_ref, xh_ref, w1_ref, b1_ref, wt_ref, b2_ref,
                          w2_ref, b3_ref, o_ref, mid_sc):
    """One (batch, row-tile) step of conv1 -> 4-phase tconv -> conv2, fused.

    x_ref  : (1, TH*W, Cin)      input pixel-rows for this tile (compute dtype)
    xh_ref : (1, 1, W, Cin)      halo row = first row of the next tile
    w1_ref : (Cin, Cmid)         1x1 conv1 weight, BN1 scale folded
    b1_ref : (1, Cmid)           BN1 bias (f32)
    wt_ref : (4*Cmid, 4*Cmid)    tconv weight: K-stacked over the 4 shifted views
                                 [m00|m01|m10|m11], columns are phases [y00|y01|y10|y11]
    b2_ref : (1, 4*Cmid)         BN2 bias tiled over phases (f32)
    w2_ref : (Cmid, Cout)        DENSE 1x1 conv2 weight, BN3 scale folded
    b3_ref : (1, Cout)           BN3 bias (f32)
    o_ref  : (1, TH, 2, W, 2*Cout)  phase-plane output (out dtype)
    mid_sc : (TH+1, W+1, Cmid)   VMEM scratch for the conv1 activation in the
                                 compute dtype (+1 halo row, +1 zero pad column)
    """
    _, TH, _, W, _ = o_ref.shape
    Cmid = w1_ref.shape[1]
    Cout = w2_ref.shape[1]
    cdt = w1_ref.dtype                     # compute (matmul / scratch) dtype

    i = pl.program_id(1)
    # Row H of the tconv input does not exist: zero the halo row of the last
    # tile (it would otherwise be relu(b1), not 0).
    keep_halo = (i < pl.num_programs(1) - 1).astype(jnp.float32)

    w1 = w1_ref[...]
    b1 = b1_ref[...]

    # --- conv1 (1x1) + BN1 + ReLU for the TH main rows and the 1 halo row ----
    mid_main = jnp.maximum(
        jnp.dot(x_ref[0], w1, preferred_element_type=jnp.float32) + b1, 0.0)
    mid_sc[0:TH, 0:W, :] = mid_main.astype(cdt).reshape(TH, W, Cmid)

    mid_halo = jnp.maximum(
        jnp.dot(xh_ref[0, 0], w1, preferred_element_type=jnp.float32) + b1, 0.0)
    mid_halo = mid_halo * keep_halo
    mid_sc[TH:TH + 1, 0:W, :] = mid_halo.astype(cdt).reshape(1, W, Cmid)

    # Column W of the tconv input does not exist: keep a zero pad column.
    mid_sc[:, W:W + 1, :] = jnp.zeros((TH + 1, 1, Cmid), cdt)

    # --- ConvTranspose2d(k=3, s=2, p=1, op=1) as 4 sub-pixel phases ----------
    # Each output parity (ry, rx) is a stride-1 conv over the un-dilated mid;
    # the 4 shifted views below are its only non-zero taps.  They are stacked
    # along K so the whole tconv is a single MXU pass (no f32 accumulate adds).
    m00 = mid_sc[0:TH, 0:W, :].reshape(TH * W, Cmid)
    m01 = mid_sc[0:TH, 1:W + 1, :].reshape(TH * W, Cmid)
    m10 = mid_sc[1:TH + 1, 0:W, :].reshape(TH * W, Cmid)
    m11 = mid_sc[1:TH + 1, 1:W + 1, :].reshape(TH * W, Cmid)
    mcat = jnp.concatenate([m00, m01, m10, m11], axis=-1)    # (TH*W, 4*Cmid)

    y = jnp.dot(mcat, wt_ref[...], preferred_element_type=jnp.float32)
    y = jnp.maximum(y + b2_ref[...], 0.0).astype(cdt)        # (TH*W, 4*Cmid)

    # --- conv2 (1x1) + BN3 + ReLU: dense weight applied per phase ------------
    w2 = w2_ref[...]
    b3 = b3_ref[...]

    def conv2_phase(p):
        zp = jnp.dot(y[:, p * Cmid:(p + 1) * Cmid], w2,
                     preferred_element_type=jnp.float32)
        return jnp.maximum(zp + b3, 0.0)                     # (TH*W, Cout)

    z00 = conv2_phase(0)
    z01 = conv2_phase(1)
    z10 = conv2_phase(2)
    z11 = conv2_phase(3)

    # Phase-plane store: row-major (TH, 2, W, 2*Cout) == (2*TH, 2*W, Cout).
    z_even = jnp.concatenate([z00, z01], axis=-1).reshape(TH, W, 2 * Cout)
    z_odd = jnp.concatenate([z10, z11], axis=-1).reshape(TH, W, 2 * Cout)
    o_ref[0, :, 0, :, :] = z_even.astype(o_ref.dtype)
    o_ref[0, :, 1, :, :] = z_odd.astype(o_ref.dtype)


# ------------------------------ JAX wrapper -------------------------------- #

def fold_bn(gamma, beta, mean, var):
    scale = gamma / jnp.sqrt(var + BN_EPS)
    bias = beta - mean * scale
    return scale.astype(jnp.float32), bias.astype(jnp.float32)


def _vmem_capacity_bytes():
    """Physical per-core VMEM; conservative (v7x-sized) fallback if unknown."""
    try:
        return int(pltpu.get_tpu_info().vmem_capacity_bytes)
    except Exception:
        return 64 << 20


def _tile_footprint_bytes(th, W, cin, cmid, cout, in_item, out_item):
    """VMEM for one grid step: pipelined blocks, weights and live temporaries."""
    pix = th * W
    x_blk = pix * cin * in_item
    halo_blk = W * cin * in_item
    out_blk = pix * 4 * cout * out_item
    weights = (cin * cmid + 16 * cmid * cmid + cmid * cout) * in_item
    biases = (cmid + 4 * cmid + cout) * 4
    pipelined = 2 * (x_blk + halo_blk + out_blk + weights + biases)
    scratch = (th + 1) * (W + 1) * cmid * in_item
    views = 4 * pix * cmid * in_item                  # m00..m11 loads
    mcat = pix * 4 * cmid * in_item
    y_buf = pix * 4 * cmid * (4 + in_item)            # f32 accumulator + cdt copy
    z_buf = pix * 4 * cout * 4 + 2 * pix * 2 * cout * (4 + out_item)
    mid_f32 = pix * cmid * 4                          # pre-cast conv1 output
    return pipelined + scratch + views + mcat + y_buf + z_buf + mid_f32


def _largest_row_tile(n_batch, H, W, cin, cmid, cout, in_item, out_item,
                      budget_bytes, max_rows):
    """Largest divisor of H fitting the VMEM budget; prefer tilings that keep
    >= 2 grid steps so megacore (dimension_semantics='parallel') has work."""
    divisors, fits = [], []
    for th in range(1, min(H, max_rows) + 1):
        if H % th:
            continue
        if (th * W) % 16 != 0 and th != H:     # keep the pixel block sublane-aligned
            continue
        divisors.append(th)
        if _tile_footprint_bytes(th, W, cin, cmid, cout,
                                 in_item, out_item) <= budget_bytes:
            fits.append(th)
    if not divisors:
        return H
    if not fits:
        return min(divisors)
    megacore_ok = [th for th in fits if n_batch * (H // th) >= 2]
    return max(megacore_ok) if megacore_ok else max(fits)


def decoder_forward_nhwc(params, x_nhwc, *, stride=2, padding=1, output_padding=1,
                         compute_dtype=jnp.bfloat16, out_dtype=None,
                         max_tile_rows=256, vmem_budget_bytes=None):
    """Fused LinkNet decoder on an NHWC activation; returns NHWC (N, 2H, 2W, Cout)."""
    if (stride, padding, output_padding) != (2, 1, 1) or params["wt"].shape[-1] != 3:
        raise NotImplementedError(
            "fused decoder kernel supports kernel_size=3, stride=2, padding=1, "
            "output_padding=1 (the LinkNet decoder configuration) only")
    out_dtype = compute_dtype if out_dtype is None else out_dtype

    x4 = x_nhwc.astype(compute_dtype)
    N, H, W, Cin = x4.shape
    wt = params["wt"]                         # PyTorch ConvTranspose2d (Cmid, Cmid, 3, 3)
    Cmid = wt.shape[0]
    Cout = params["w2"].shape[1]

    s1, b1 = fold_bn(*params["bn1"])
    s2, b2 = fold_bn(*params["bn2"])
    s3, b3 = fold_bn(*params["bn3"])

    # Fold BN scales into the conv weights; only bias + ReLU remain in-kernel.
    w1f = (params["w1"].astype(jnp.float32) * s1[None, :]).astype(compute_dtype)

    def tap(kh, kw):                          # (Cmid_in, Cmid_out), BN2 scale folded
        return wt[:, :, kh, kw].astype(jnp.float32) * s2[None, :]

    zero = jnp.zeros((Cmid, Cmid), jnp.float32)
    # Row block p multiplies the p-th shifted view of mid (m00, m01, m10, m11);
    # columns are the 4 sub-pixel output phases [y00 | y01 | y10 | y11].
    wt_phases = jnp.stack([
        jnp.concatenate([tap(1, 1), tap(1, 2), tap(2, 1), tap(2, 2)], axis=1),
        jnp.concatenate([zero,      tap(1, 0), zero,      tap(2, 0)], axis=1),
        jnp.concatenate([zero,      zero,      tap(0, 1), tap(0, 2)], axis=1),
        jnp.concatenate([zero,      zero,      zero,      tap(0, 0)], axis=1),
    ], axis=0)
    wt_flat = wt_phases.reshape(4 * Cmid, 4 * Cmid).astype(compute_dtype)
    b2t = jnp.tile(b2, 4).reshape(1, 4 * Cmid)

    # Dense conv2 weight (no block-diagonal zero blocks), BN3 scale folded.
    w2f = (params["w2"].astype(jnp.float32) * s3[None, :]).astype(compute_dtype)

    in_item = jnp.dtype(compute_dtype).itemsize
    out_item = jnp.dtype(out_dtype).itemsize

    cap = _vmem_capacity_bytes()
    if vmem_budget_bytes is None:
        # Generation-aware: ~32 MiB on 128-MiB parts (v5e/v6e), ~16 MiB on v7x.
        vmem_budget_bytes = min(max(cap // 4, 8 << 20), 48 << 20)
    vmem_limit = int(min(cap * 3 // 4, max(2 * vmem_budget_bytes, 64 << 20)))

    TH = _largest_row_tile(N, H, W, Cin, Cmid, Cout, in_item, out_item,
                           vmem_budget_bytes, max_tile_rows)
    nT = H // TH

    # Halo rows: row (i+1)*TH of x for every row-tile i (zeros past the last row).
    halo = jnp.concatenate(
        [x4[:, TH::TH, :, :], jnp.zeros((N, 1, W, Cin), compute_dtype)], axis=1)
    x3 = x4.reshape(N, H * W, Cin)

    out_shape = jax.ShapeDtypeStruct((N, H, 2, W, 2 * Cout), out_dtype)

    flops = 2 * N * H * W * (Cin * Cmid + 16 * Cmid * Cmid + 4 * Cmid * Cout)
    bytes_accessed = (
        (x3.size + halo.size + w1f.size + wt_flat.size + w2f.size) * in_item
        + (b1.size + b2t.size + b3.size) * 4
        + N * H * W * 4 * Cout * out_item)

    out = pl.pallas_call(
        _fused_decoder_kernel,
        out_shape=out_shape,
        grid_spec=pltpu.PrefetchScalarGridSpec(
            num_scalar_prefetch=0,
            grid=(N, nT),
            in_specs=[
                pl.BlockSpec((1, TH * W, Cin), lambda n, i: (n, i, 0)),
                pl.BlockSpec((1, 1, W, Cin), lambda n, i: (n, i, 0, 0)),
                pl.BlockSpec((Cin, Cmid), lambda n, i: (0, 0)),
                pl.BlockSpec((1, Cmid), lambda n, i: (0, 0)),
                pl.BlockSpec((4 * Cmid, 4 * Cmid), lambda n, i: (0, 0)),
                pl.BlockSpec((1, 4 * Cmid), lambda n, i: (0, 0)),
                pl.BlockSpec((Cmid, Cout), lambda n, i: (0, 0)),
                pl.BlockSpec((1, Cout), lambda n, i: (0, 0)),
            ],
            out_specs=pl.BlockSpec((1, TH, 2, W, 2 * Cout),
                                   lambda n, i: (n, i, 0, 0, 0)),
            scratch_shapes=[pltpu.VMEM((TH + 1, W + 1, Cmid), compute_dtype)],
        ),
        compiler_params=pltpu.CompilerParams(
            dimension_semantics=("parallel", "parallel"),
            vmem_limit_bytes=vmem_limit),
        cost_estimate=pl.CostEstimate(flops=flops, transcendentals=0,
                                      bytes_accessed=bytes_accessed),
    )(x3, halo, w1f, b1.reshape(1, Cmid), wt_flat, b2t, w2f, b3.reshape(1, Cout))

    # (N, H, 2, W, 2*Cout) in row-major order IS (N, 2H, 2W, Cout): free reshape.
    return out.reshape(N, 2 * H, 2 * W, Cout)


def decoder_forward(params, x_nchw, **kwargs):
    """NCHW wrapper matching the PyTorch module interface."""
    # TODO(synk): prefer decoder_forward_nhwc end-to-end in a LinkNet stack; the
    # two transposes below are full HBM passes over the activations.
    out = decoder_forward_nhwc(params, jnp.transpose(x_nchw, (0, 2, 3, 1)), **kwargs)
    return jnp.transpose(out, (0, 3, 1, 2))


# ----------------------------- parameter init ------------------------------ #

def init_decoder_params(key, in_planes, out_planes, kernel_size):
    mid = in_planes // 4
    ks = jax.random.split(key, 6)

    def bn(k, c):
        k1, k2, k3, k4 = jax.random.split(k, 4)
        gamma = 1.0 + 0.1 * jax.random.normal(k1, (c,), jnp.float32)
        beta = 0.1 * jax.random.normal(k2, (c,), jnp.float32)
        mean = 0.1 * jax.random.normal(k3, (c,), jnp.float32)
        var = 1.0 + 0.1 * jnp.abs(jax.random.normal(k4, (c,), jnp.float32))
        return gamma, beta, mean, var

    return dict(
        # 1x1 convs stored directly as (Cin, Cout) matmul weights
        w1=0.1 * jax.random.normal(ks[0], (in_planes, mid), jnp.float32),
        bn1=bn(ks[1], mid),
        # ConvTranspose2d weight in PyTorch layout (Cin, Cout, K, K)
        wt=0.1 * jax.random.normal(ks[2], (mid, mid, kernel_size, kernel_size),
                                   jnp.float32),
        bn2=bn(ks[3], mid),
        w2=0.1 * jax.random.normal(ks[4], (mid, out_planes), jnp.float32),
        bn3=bn(ks[5], out_planes),
    )


# --------------------------- pure-JAX reference ----------------------------- #

def decoder_reference(params, x_nchw, *, stride, padding, output_padding):
    dn = ('NHWC', 'HWIO', 'NHWC')
    x = jnp.transpose(x_nchw, (0, 2, 3, 1)).astype(jnp.float32)
    s1, b1 = fold_bn(*params["bn1"])
    s2, b2 = fold_bn(*params["bn2"])
    s3, b3 = fold_bn(*params["bn3"])

    w1 = params["w1"].reshape(1, 1, *params["w1"].shape)
    y = lax.conv_general_dilated(x, w1, (1, 1), 'VALID', dimension_numbers=dn)
    y = jnp.maximum(y * s1 + b1, 0.0)

    K = params["wt"].shape[-1]
    w_hwio = jnp.flip(params["wt"], axis=(2, 3)).transpose(2, 3, 0, 1)
    pad = [(K - 1 - padding, K - 1 - padding + output_padding)] * 2
    y = lax.conv_general_dilated(y, w_hwio, (1, 1), pad,
                                 lhs_dilation=(stride, stride),
                                 dimension_numbers=dn)
    y = jnp.maximum(y * s2 + b2, 0.0)

    w2 = params["w2"].reshape(1, 1, *params["w2"].shape)
    y = lax.conv_general_dilated(y, w2, (1, 1), 'VALID', dimension_numbers=dn)
    y = jnp.maximum(y * s3 + b3, 0.0)
    return jnp.transpose(y, (0, 3, 1, 2))


if __name__ == "__main__":
    in_planes, out_planes = 16, 8
    kernel_size, stride, padding, output_padding = 3, 2, 1, 1
    N, H, W = 2, 16, 16

    key = jax.random.PRNGKey(0)
    kx, kp = jax.random.split(key)
    x = jax.random.normal(kx, (N, in_planes, H, W), jnp.float32)   # NCHW input
    params = init_decoder_params(kp, in_planes, out_planes, kernel_size)

    ref = decoder_reference(params, x, stride=stride, padding=padding,
                            output_padding=output_padding)

    # f32 compute + f32 output, multi-row-tile grid (exercises row-halo handling).
    out_f32 = jax.block_until_ready(
        decoder_forward(params, x, stride=stride, padding=padding,
                        output_padding=output_padding,
                        compute_dtype=jnp.float32, out_dtype=jnp.float32,
                        max_tile_rows=4))
    assert out_f32.shape == (N, out_planes, H * stride, W * stride), out_f32.shape
    assert jnp.allclose(out_f32, ref, rtol=1e-4, atol=1e-4), \
        float(jnp.max(jnp.abs(out_f32 - ref)))

    # Default fast path: bf16 matmuls + bf16 output (looser tolerance).
    out_bf16 = jax.block_until_ready(
        decoder_forward(params, x, stride=stride, padding=padding,
                        output_padding=output_padding,
                        compute_dtype=jnp.bfloat16))
    assert out_bf16.shape == (N, out_planes, H * stride, W * stride)
    assert jnp.allclose(out_bf16.astype(jnp.float32), ref, rtol=3e-2, atol=3e-2), \
        float(jnp.max(jnp.abs(out_bf16.astype(jnp.float32) - ref)))

    print("KERNEL_OK")
</pallas_src>

<mosaic_0001>
module attributes {stable_mosaic.version = 11 : i64} {
  func.func @_fused_decoder_kernel(%arg0: i32, %arg1: i32, %arg2: memref<1x64x16xf32, #tpu.memory_space<vmem>>, %arg3: memref<1x1x16x16xf32, #tpu.memory_space<vmem>>, %arg4: memref<16x4xf32, #tpu.memory_space<vmem>>, %arg5: memref<1x4xf32, #tpu.memory_space<vmem>>, %arg6: memref<16x16xf32, #tpu.memory_space<vmem>>, %arg7: memref<1x16xf32, #tpu.memory_space<vmem>>, %arg8: memref<4x8xf32, #tpu.memory_space<vmem>>, %arg9: memref<1x8xf32, #tpu.memory_space<vmem>>, %arg10: memref<1x4x2x16x16xf32, #tpu.memory_space<vmem>>, %arg11: memref<5x17x4xf32, #tpu.memory_space<vmem>>) attributes {dimension_semantics = [#tpu.dimension_semantics<parallel>, #tpu.dimension_semantics<parallel>], iteration_bounds = array<i64: 2, 4>, scalar_prefetch = 0 : i64, scratch_operands = 1 : i64, tpu.core_type = #tpu.core_type<tc>, window_params = [{transform_indices = @transform_0, window_bounds = array<i64: 1, 64, 16>}, {transform_indices = @transform_1, window_bounds = array<i64: 1, 1, 16, 16>}, {pipeline_mode = #tpu.pipeline_mode<synchronous>, transform_indices = @transform_2, window_bounds = array<i64: 16, 4>}, {pipeline_mode = #tpu.pipeline_mode<synchronous>, transform_indices = @transform_3, window_bounds = array<i64: 1, 4>}, {pipeline_mode = #tpu.pipeline_mode<synchronous>, transform_indices = @transform_4, window_bounds = array<i64: 16, 16>}, {pipeline_mode = #tpu.pipeline_mode<synchronous>, transform_indices = @transform_5, window_bounds = array<i64: 1, 16>}, {pipeline_mode = #tpu.pipeline_mode<synchronous>, transform_indices = @transform_6, window_bounds = array<i64: 4, 8>}, {pipeline_mode = #tpu.pipeline_mode<synchronous>, transform_indices = @transform_7, window_bounds = array<i64: 1, 8>}, {transform_indices = @transform_8, window_bounds = array<i64: 1, 4, 2, 16, 16>}]} {
    %c3_i32 = arith.constant 3 : i32
    %0 = arith.cmpi slt, %arg1, %c3_i32 : i32
    %1 = arith.extui %0 : i1 to i32
    %2 = arith.sitofp %1 : i32 to f32
    %c0 = arith.constant 0 : index
    %c0_0 = arith.constant 0 : index
    %3 = vector.load %arg4[%c0, %c0_0] : memref<16x4xf32, #tpu.memory_space<vmem>>, vector<16x4xf32>
    %c0_1 = arith.constant 0 : index
    %c0_2 = arith.constant 0 : index
    %4 = vector.load %arg5[%c0_1, %c0_2] : memref<1x4xf32, #tpu.memory_space<vmem>>, vector<1x4xf32>
    %c0_3 = arith.constant 0 : index
    %c0_4 = arith.constant 0 : index
    %c0_5 = arith.constant 0 : index
    %5 = vector.load %arg2[%c0_3, %c0_4, %c0_5] : memref<1x64x16xf32, #tpu.memory_space<vmem>>, vector<1x64x16xf32>
    %6 = vector.shape_cast %5 : vector<1x64x16xf32> to vector<64x16xf32>
    %cst = arith.constant dense<0.000000e+00> : vector<64x4xf32>
    %7 = tpu.matmul %6, %3, %cst {dimension_numbers = #tpu.dot_dimension_numbers<[1], [0], [0], [1], [0, 0, 1, 1], [], []>} : vector<64x16xf32>, vector<16x4xf32>, vector<64x4xf32> -> vector<64x4xf32>
    %8 = vector.broadcast %4 : vector<1x4xf32> to vector<64x4xf32>
    %9 = arith.addf %7, %8 : vector<64x4xf32>
    %cst_6 = arith.constant 0.000000e+00 : f32
    %10 = vector.broadcast %cst_6 : f32 to vector<64x4xf32>
    %11 = arith.maximumf %9, %10 : vector<64x4xf32>
    %12 = vector.shape_cast %11 : vector<64x4xf32> to vector<4x16x4xf32>
    %c0_7 = arith.constant 0 : index
    %c0_8 = arith.constant 0 : index
    %c0_9 = arith.constant 0 : index
    %13 = vector.load %arg11[%c0_7, %c0_8, %c0_9] : memref<5x17x4xf32, #tpu.memory_space<vmem>>, vector<4x16x4xf32>
    tpu.vector_store %arg11[%c0_7, %c0_8, %c0_9], %12 {strides = array<i32>} : memref<5x17x4xf32, #tpu.memory_space<vmem>>, vector<4x16x4xf32>,
    %c0_10 = arith.constant 0 : index
    %c0_11 = arith.constant 0 : index
    %c0_12 = arith.constant 0 : index
    %c0_13 = arith.constant 0 : index
    %14 = vector.load %arg3[%c0_10, %c0_11, %c0_12, %c0_13] : memref<1x1x16x16xf32, #tpu.memory_space<vmem>>, vector<1x1x16x16xf32>
    %15 = vector.shape_cast %14 : vector<1x1x16x16xf32> to vector<16x16xf32>
    %cst_14 = arith.constant dense<0.000000e+00> : vector<16x4xf32>
    %16 = tpu.matmul %15, %3, %cst_14 {dimension_numbers = #tpu.dot_dimension_numbers<[1], [0], [0], [1], [0, 0, 1, 1], [], []>} : vector<16x16xf32>, vector<16x4xf32>, vector<16x4xf32> -> vector<16x4xf32>
    %17 = vector.broadcast %4 : vector<1x4xf32> to vector<16x4xf32>
    %18 = arith.addf %16, %17 : vector<16x4xf32>
    %cst_15 = arith.constant 0.000000e+00 : f32
    %19 = vector.broadcast %cst_15 : f32 to vector<16x4xf32>
    %20 = arith.maximumf %18, %19 : vector<16x4xf32>
    %21 = vector.broadcast %2 : f32 to vector<16x4xf32>
    %22 = arith.mulf %20, %21 : vector<16x4xf32>
    %23 = vector.shape_cast %22 : vector<16x4xf32> to vector<1x16x4xf32>
    %c4 = arith.constant 4 : index
    %c0_16 = arith.constant 0 : index
    %c0_17 = arith.constant 0 : index
    %24 = vector.load %arg11[%c4, %c0_16, %c0_17] : memref<5x17x4xf32, #tpu.memory_space<vmem>>, vector<1x16x4xf32>
    tpu.vector_store %arg11[%c4, %c0_16, %c0_17], %23 {strides = array<i32>} : memref<5x17x4xf32, #tpu.memory_space<vmem>>, vector<1x16x4xf32>,
    %cst_18 = arith.constant 0.000000e+00 : f32
    %25 = vector.broadcast %cst_18 : f32 to vector<5x1x4xf32>
    %c0_19 = arith.constant 0 : index
    %c16 = arith.constant 16 : index
    %c0_20 = arith.constant 0 : index
    %26 = vector.load %arg11[%c0_19, %c16, %c0_20] : memref<5x17x4xf32, #tpu.memory_space<vmem>>, vector<5x1x4xf32>
    tpu.vector_store %arg11[%c0_19, %c16, %c0_20], %25 {strides = array<i32>} : memref<5x17x4xf32, #tpu.memory_space<vmem>>, vector<5x1x4xf32>,
    %c0_21 = arith.constant 0 : index
    %c0_22 = arith.constant 0 : index
    %c0_23 = arith.constant 0 : index
    %27 = vector.load %arg11[%c0_21, %c0_22, %c0_23] : memref<5x17x4xf32, #tpu.memory_space<vmem>>, vector<4x16x4xf32>
    %28 = vector.shape_cast %27 : vector<4x16x4xf32> to vector<64x4xf32>
    %c0_24 = arith.constant 0 : index
    %c1 = arith.constant 1 : index
    %c0_25 = arith.constant 0 : index
    %29 = vector.load %arg11[%c0_24, %c1, %c0_25] : memref<5x17x4xf32, #tpu.memory_space<vmem>>, vector<4x16x4xf32>
    %30 = vector.shape_cast %29 : vector<4x16x4xf32> to vector<64x4xf32>
    %c1_26 = arith.constant 1 : index
    %c0_27 = arith.constant 0 : index
    %c0_28 = arith.constant 0 : index
    %31 = vector.load %arg11[%c1_26, %c0_27, %c0_28] : memref<5x17x4xf32, #tpu.memory_space<vmem>>, vector<4x16x4xf32>
    %32 = vector.shape_cast %31 : vector<4x16x4xf32> to vector<64x4xf32>
    %c1_29 = arith.constant 1 : index
    %c1_30 = arith.constant 1 : index
    %c0_31 = arith.constant 0 : index
    %33 = vector.load %arg11[%c1_29, %c1_30, %c0_31] : memref<5x17x4xf32, #tpu.memory_space<vmem>>, vector<4x16x4xf32>
    %34 = vector.shape_cast %33 : vector<4x16x4xf32> to vector<64x4xf32>
    %35 = tpu.concatenate %28, %30, %32, %34 in 1 : vector<64x4xf32>, vector<64x4xf32>, vector<64x4xf32>, vector<64x4xf32> -> vector<64x16xf32>
    %c0_32 = arith.constant 0 : index
    %c0_33 = arith.constant 0 : index
    %36 = vector.load %arg6[%c0_32, %c0_33] : memref<16x16xf32, #tpu.memory_space<vmem>>, vector<16x16xf32>
    %cst_34 = arith.constant dense<0.000000e+00> : vector<64x16xf32>
    %37 = tpu.matmul %35, %36, %cst_34 {dimension_numbers = #tpu.dot_dimension_numbers<[1], [0], [0], [1], [0, 0, 1, 1], [], []>} : vector<64x16xf32>, vector<16x16xf32>, vector<64x16xf32> -> vector<64x16xf32>
    %c0_35 = arith.constant 0 : index
    %c0_36 = arith.constant 0 : index
    %38 = vector.load %arg7[%c0_35, %c0_36] : memref<1x16xf32, #tpu.memory_space<vmem>>, vector<1x16xf32>
    %39 = vector.broadcast %38 : vector<1x16xf32> to vector<64x16xf32>
    %40 = arith.addf %37, %39 : vector<64x16xf32>
    %cst_37 = arith.constant 0.000000e+00 : f32
    %41 = vector.broadcast %cst_37 : f32 to vector<64x16xf32>
    %42 = arith.maximumf %40, %41 : vector<64x16xf32>
    %c0_38 = arith.constant 0 : index
    %c0_39 = arith.constant 0 : index
    %43 = vector.load %arg8[%c0_38, %c0_39] : memref<4x8xf32, #tpu.memory_space<vmem>>, vector<4x8xf32>
    %c0_40 = arith.constant 0 : index
    %c0_41 = arith.constant 0 : index
    %44 = vector.load %arg9[%c0_40, %c0_41] : memref<1x8xf32, #tpu.memory_space<vmem>>, vector<1x8xf32>
    %45 = vector.extract_strided_slice %42 {offsets = [0, 0], sizes = [64, 4], strides = [1, 1]} : vector<64x16xf32> to vector<64x4xf32>
    %cst_42 = arith.constant dense<0.000000e+00> : vector<64x8xf32>
    %46 = tpu.matmul %45, %43, %cst_42 {dimension_numbers = #tpu.dot_dimension_numbers<[1], [0], [0], [1], [0, 0, 1, 1], [], []>} : vector<64x4xf32>, vector<4x8xf32>, vector<64x8xf32> -> vector<64x8xf32>
    %47 = vector.broadcast %44 : vector<1x8xf32> to vector<64x8xf32>
    %48 = arith.addf %46, %47 : vector<64x8xf32>
    %cst_43 = arith.constant 0.000000e+00 : f32
    %49 = vector.broadcast %cst_43 : f32 to vector<64x8xf32>
    %50 = arith.maximumf %48, %49 : vector<64x8xf32>
    %51 = vector.extract_strided_slice %42 {offsets = [0, 4], sizes = [64, 4], strides = [1, 1]} : vector<64x16xf32> to vector<64x4xf32>
    %cst_44 = arith.constant dense<0.000000e+00> : vector<64x8xf32>
    %52 = tpu.matmul %51, %43, %cst_44 {dimension_numbers = #tpu.dot_dimension_numbers<[1], [0], [0], [1], [0, 0, 1, 1], [], []>} : vector<64x4xf32>, vector<4x8xf32>, vector<64x8xf32> -> vector<64x8xf32>
    %53 = vector.broadcast %44 : vector<1x8xf32> to vector<64x8xf32>
    %54 = arith.addf %52, %53 : vector<64x8xf32>
    %cst_45 = arith.constant 0.000000e+00 : f32
    %55 = vector.broadcast %cst_45 : f32 to vector<64x8xf32>
    %56 = arith.maximumf %54, %55 : vector<64x8xf32>
    %57 = vector.extract_strided_slice %42 {offsets = [0, 8], sizes = [64, 4], strides = [1, 1]} : vector<64x16xf32> to vector<64x4xf32>
    %cst_46 = arith.constant dense<0.000000e+00> : vector<64x8xf32>
    %58 = tpu.matmul %57, %43, %cst_46 {dimension_numbers = #tpu.dot_dimension_numbers<[1], [0], [0], [1], [0, 0, 1, 1], [], []>} : vector<64x4xf32>, vector<4x8xf32>, vector<64x8xf32> -> vector<64x8xf32>
    %59 = vector.broadcast %44 : vector<1x8xf32> to vector<64x8xf32>
    %60 = arith.addf %58, %59 : vector<64x8xf32>
    %cst_47 = arith.constant 0.000000e+00 : f32
    %61 = vector.broadcast %cst_47 : f32 to vector<64x8xf32>
    %62 = arith.maximumf %60, %61 : vector<64x8xf32>
    %63 = vector.extract_strided_slice %42 {offsets = [0, 12], sizes = [64, 4], strides = [1, 1]} : vector<64x16xf32> to vector<64x4xf32>
    %cst_48 = arith.constant dense<0.000000e+00> : vector<64x8xf32>
    %64 = tpu.matmul %63, %43, %cst_48 {dimension_numbers = #tpu.dot_dimension_numbers<[1], [0], [0], [1], [0, 0, 1, 1], [], []>} : vector<64x4xf32>, vector<4x8xf32>, vector<64x8xf32> -> vector<64x8xf32>
    %65 = vector.broadcast %44 : vector<1x8xf32> to vector<64x8xf32>
    %66 = arith.addf %64, %65 : vector<64x8xf32>
    %cst_49 = arith.constant 0.000000e+00 : f32
    %67 = vector.broadcast %cst_49 : f32 to vector<64x8xf32>
    %68 = arith.maximumf %66, %67 : vector<64x8xf32>
    %69 = tpu.concatenate %50, %56 in 1 : vector<64x8xf32>, vector<64x8xf32> -> vector<64x16xf32>
    %70 = vector.shape_cast %69 : vector<64x16xf32> to vector<4x16x16xf32>
    %71 = tpu.concatenate %62, %68 in 1 : vector<64x8xf32>, vector<64x8xf32> -> vector<64x16xf32>
    %72 = vector.shape_cast %71 : vector<64x16xf32> to vector<4x16x16xf32>
    %c0_50 = arith.constant 0 : index
    %c0_51 = arith.constant 0 : index
    %c0_52 = arith.constant 0 : index
    %c0_53 = arith.constant 0 : index
    %c0_54 = arith.constant 0 : index
    %73 = vector.load %arg10[%c0_50, %c0_51, %c0_52, %c0_53, %c0_54] : memref<1x4x2x16x16xf32, #tpu.memory_space<vmem>>, vector<1x4x1x16x16xf32>
    %74 = vector.shape_cast %73 : vector<1x4x1x16x16xf32> to vector<4x16x16xf32>
    %75 = vector.shape_cast %70 : vector<4x16x16xf32> to vector<1x4x1x16x16xf32>
    tpu.vector_store %arg10[%c0_50, %c0_51, %c0_52, %c0_53, %c0_54], %75 {strides = array<i32>} : memref<1x4x2x16x16xf32, #tpu.memory_space<vmem>>, vector<1x4x1x16x16xf32>,
    %c0_55 = arith.constant 0 : index
    %c0_56 = arith.constant 0 : index
    %c1_57 = arith.constant 1 : index
    %c0_58 = arith.constant 0 : index
    %c0_59 = arith.constant 0 : index
    %76 = vector.load %arg10[%c0_55, %c0_56, %c1_57, %c0_58, %c0_59] : memref<1x4x2x16x16xf32, #tpu.memory_space<vmem>>, vector<1x4x1x16x16xf32>
    %77 = vector.shape_cast %76 : vector<1x4x1x16x16xf32> to vector<4x16x16xf32>
    %78 = vector.shape_cast %72 : vector<4x16x16xf32> to vector<1x4x1x16x16xf32>
    tpu.vector_store %arg10[%c0_55, %c0_56, %c1_57, %c0_58, %c0_59], %78 {strides = array<i32>} : memref<1x4x2x16x16xf32, #tpu.memory_space<vmem>>, vector<1x4x1x16x16xf32>,
    return
  }
  func.func @transform_0(%arg0: i32, %arg1: i32) -> (i32, i32, i32) {
    %c0_i32 = arith.constant 0 : i32
    %c0_i32_0 = arith.constant 0 : i32
    return %arg0, %arg1, %c0_i32 : i32, i32, i32
  }
  func.func @transform_1(%arg0: i32, %arg1: i32) -> (i32, i32, i32, i32) {
    %c0_i32 = arith.constant 0 : i32
    %c0_i32_0 = arith.constant 0 : i32
    %c0_i32_1 = arith.constant 0 : i32
    return %arg0, %arg1, %c0_i32, %c0_i32_0 : i32, i32, i32, i32
  }
  func.func @transform_2(%arg0: i32, %arg1: i32) -> (i32, i32) {
    %c0_i32 = arith.constant 0 : i32
    %c0_i32_0 = arith.constant 0 : i32
    %c0_i32_1 = arith.constant 0 : i32
    return %c0_i32, %c0_i32_0 : i32, i32
  }
  func.func @transform_3(%arg0: i32, %arg1: i32) -> (i32, i32) {
    %c0_i32 = arith.constant 0 : i32
    %c0_i32_0 = arith.constant 0 : i32
    %c0_i32_1 = arith.constant 0 : i32
    return %c0_i32, %c0_i32_0 : i32, i32
  }
  func.func @transform_4(%arg0: i32, %arg1: i32) -> (i32, i32) {
    %c0_i32 = arith.constant 0 : i32
    %c0_i32_0 = arith.constant 0 : i32
    %c0_i32_1 = arith.constant 0 : i32
    return %c0_i32, %c0_i32_0 : i32, i32
  }
  func.func @transform_5(%arg0: i32, %arg1: i32) -> (i32, i32) {
    %c0_i32 = arith.constant 0 : i32
    %c0_i32_0 = arith.constant 0 : i32
    %c0_i32_1 = arith.constant 0 : i32
    return %c0_i32, %c0_i32_0 : i32, i32
  }
  func.func @transform_6(%arg0: i32, %arg1: i32) -> (i32, i32) {
    %c0_i32 = arith.constant 0 : i32
    %c0_i32_0 = arith.constant 0 : i32
    %c0_i32_1 = arith.constant 0 : i32
    return %c0_i32, %c0_i32_0 : i32, i32
  }
  func.func @transform_7(%arg0: i32, %arg1: i32) -> (i32, i32) {
    %c0_i32 = arith.constant 0 : i32
    %c0_i32_0 = arith.constant 0 : i32
    %c0_i32_1 = arith.constant 0 : i32
    return %c0_i32, %c0_i32_0 : i32, i32
  }
  func.func @transform_8(%arg0: i32, %arg1: i32) -> (i32, i32, i32, i32, i32) {
    %c0_i32 = arith.constant 0 : i32
    %c0_i32_0 = arith.constant 0 : i32
    %c0_i32_1 = arith.constant 0 : i32
    %c0_i32_2 = arith.constant 0 : i32
    return %arg0, %arg1, %c0_i32, %c0_i32_0, %c0_i32_1 : i32, i32, i32, i32, i32
  }
}

</mosaic_0001>

<bundles_post_ra>
// kernel: tpu_custom_call.1
= control target key start
LH: loop header
LB: loop body
LE: loop exit
PB: predicated region body
PF: predicated region fallthrough
CT: control target
= control target key end

     0   :  { %s2629_s0 = inlined_call_operand.vmem [shape: f32[2,256,16], index: 0, kind: input, shape index: {}]   ;;  %s2630_s1 = inlined_call_operand.vmem [shape: f32[2,4,16,16], index: 1, kind: input, shape index: {}]   ;;  %s2631_s2 = inlined_call_operand.vmem [shape: f32[16,4], index: 2, kind: input, shape index: {}]   ;;  %s2632_s3 = inlined_call_operand.vmem [shape: f32[1,4], index: 3, kind: input, shape index: {}]   ;;  %s2633_s4 = inlined_call_operand.vmem [shape: f32[16,16], index: 4, kind: input, shape index: {}]   ;;  %s2634_s5 = inlined_call_operand.vmem [shape: f32[1,16], index: 5, kind: input, shape index: {}]   ;;  %s2635_s6 = inlined_call_operand.vmem [shape: f32[4,8], index: 6, kind: input, shape index: {}]   ;;  %s2636_s7 = inlined_call_operand.vmem [shape: f32[1,8], index: 7, kind: input, shape index: {}]   ;;  %s2637_s8 = inlined_call_operand.hbm [shape: f32[2,16,2,16,16], index: 8, kind: output, shape index: {}]  }
   0x1   :  { %2640 = sst [smem:[#allocation8_spill]] %s2631_s2 }
   0x2   :  { %13 = vsyncpa [#allocation4], 0 }
   0x3   :  { %15 = vsyncpa [#allocation4 + $0x1], 0  ;;  %s2202_s27 = smov 0   ;;  %s2204_s28 = smov 0  }
   0x4   :  { %s2206_s29 = smov 0   ;;  %s2208_s30 = smov 0  }
   0x5   :  { %s2210_s9 = smov 0   ;;  %s2212_s10 = smov 0  }
   0x6   :  { %s2214_s11 = smov 0   ;;  %s2216_s12 = smov 0  }
   0x7 LB: > { %s1735_s13 = sadd.s32 4294967295, %s2146_s12   ;;  %s1736_s14 = sadd.s32 4294967294, %s2146_s12   ;;  %s2146_s12 = sphi %s2216_s12, %s21_s12   ;;  %s2142_s11 = sphi %s2214_s11, %s2654_s11   ;;  %s2138_s10 = sphi %s2212_s10, %s2653_s10   ;;  %s2134_s9 = sphi %s2210_s9, %s2652_s9   ;;  %s2130_s30 = sphi %s2208_s30, %s2651_s30   ;;  %s2126_s29 = sphi %s2206_s29, %s2650_s29   ;;  %s2122_s28 = sphi %s2204_s28, %s2649_s28   ;;  %s2118_s27 = sphi %s2202_s27, %s2648_s27  }
   0x8   : > { %s30_s15 = sadd.s32 1, %s2138_s10  ;;  %s33_s16 = sadd.s32 1, %s2142_s11 }
   0x9   : > { %p31_p0 = scmp.ge.s32.totalorder %s30_s15, 4  ;;  %p234_p1 = scmp.ne.s32.totalorder %s2126_s29, %s2122_s28 }
   0xa   : > { %p235_p2 = scmp.eq.s32.totalorder %s1735_s13, 7  ;;  %p240_p5 = scmp.ne.s32.totalorder %s2122_s28, %s2118_s27 }
   0xb   : > { %s2656_s15 = smov (%p31_p0, %s30_s15), 0  ;;  %s2658_s16 = smov (!%p31_p0, %s33_s16), %s2142_s11 }
   0xc   : > { %2641 = sst [smem:[#allocation6_spill]] %s2656_s15  ;;  %s220_s17 = ssub.s32 %s2138_s10, %s2656_s15 }
   0xd   : > { %p2253_p3 = por %p235_p2, %p234_p1  ;;  %p35_p4 = scmp.ge.s32.totalorder %s2658_s16, 2 }
   0xe   : > { %p241_p6 = scmp.eq.s32.totalorder %s1736_s14, 7  ;;  %p1739_p7 = scmp.ge.s32.totalorder %s2146_s12, 1 }
   0xf   : > { %s2660_s16 = smov (%p35_p4, %s2658_s16), 0  ;;  %p302_p9 = scmp.lt.s32.totalorder %s2146_s12, 9 }
  0x10   : > { %2643 = sst [smem:[#allocation7_spill]] %s2660_s16  ;;  %p2262_p8 = por %p241_p6, %p240_p5 }
  0x11   : > { %s219_s20 = ssub.s32 %s2142_s11, %s2660_s16  ;;  %s224_s21 = sadd.s32 1, %s2126_s29 }
  0x12   : > { %s221_s22 = sor.u32 %s220_s17, %s219_s20  ;;  %p303_p10 = pnand %p1739_p7, %p302_p9 }
  0x13   : > { %p222_p11 = scmp.eq.s32.totalorder %s221_s22, 0  ;;  %s2645_s2 = sld [smem:[#allocation8_spill]] (!%p303_p10) }
  0x14   : > { %306 = sbr.rel (%p303_p10) target bundleno = 1066 (0x42a), region = 52  ;;  %s1741_s14 = sshll.u32 (!%p303_p10), %s2130_s30, 3 }
  0x15   : > { %s2271_s23 = scalar_select %p222_p11, %s2126_s29, %s224_s21  }
  0x16   : > { %p350_p12 = scmp.lt.s32.totalorder (!%p303_p10), %s2134_s9, 1  ;;  %p352_p13 = scmp.lt.s32.totalorder (!%p303_p10), %s1741_s14, 31 }
  0x17   : > { %p361_p0 = scmp.lt.s32.totalorder (!%p303_p10), %s2130_s30, 3  ;;  %s2149_s24 = smov (!%p303_p10), 4  }
  0x18   : > { %s2150_s25 = smov (!%p303_p10), 8  }
  0x19   : > { %v373_v0 = vld [vmem:[%s2645_s2 + $0x8] sm:$0xff]  ;;  %v372_v1 = vld [vmem:[%s2645_s2] sm:$0xff]  ;;  %s351_s17 = scalar_select %p350_p12, %s2134_s9, 1  ;;  %vm389_vm0 = vcmask 130048   ;;  %vm627_vm1 = vcmask 24576   ;;  %v2148_v12 = vmov 0.0  }
  0x1a   : > { %1880 = vmatprep.subr.mxu0 %v373_v0  ;;  %1896 = vmatprep.subr.mxu1 %v373_v0  ;;  %s2662_s14 = smov (!%p352_p13, %s1741_s14), 31  ;;  %628 = vst.msk [vmem:[#allocation2 + $0x10] sm:$0x1] %vm627_vm1, %v2148_v12  ;;  %629 = vst.msk [vmem:[#allocation2 + $0x28] sm:$0x1] %vm627_vm1, %v2148_v12  ;;  %vm527_vm2 = vcmask 31744  }
  0x1b   : > { %1881 = vmatpush3.msra.mxu0 %v373_v0  ;;  %1897 = vmatpush3.msra.mxu1 %v373_v0  ;;  %s1742_s20 = sshll.u32 %s351_s17, 5  ;;  %s1745_s13 = sshll.u32 %s351_s17, 3  ;;  %630 = vst.msk [vmem:[#allocation2 + $0x40] sm:$0x1] %vm627_vm1, %v2148_v12  ;;  %631 = vst.msk [vmem:[#allocation2 + $0x58] sm:$0x1] %vm627_vm1, %v2148_v12 }
  0x1c   : > { %1882 = vmatprep.subr.mxu0 %v372_v1  ;;  %1898 = vmatprep.subr.mxu1 %v372_v1  ;;  %s355_s21 = sadd.s32 %s1742_s20, %s2662_s14  ;;  %632 = vst.msk [vmem:[#allocation2 + $0x70] sm:$0x1] %vm627_vm1, %v2148_v12  ;;  %v1747_v13 = vld [vmem:[%s2632_s3] ss:$0 sm:$0xff]  ;;  %v789_v50 = vld [vmem:[%s2633_s4 + $0x8] sm:$0xff]  ;;  %vm770_vm3 = vcmask 64512  }
  0x1d   : > { %1883 = vmatpush3.msra.mxu0 %v372_v1  ;;  %1899 = vmatpush3.msra.mxu1 %v372_v1  ;;  %s1743_s22 = sshll.u32 %s355_s21, 3  ;;  %v788_v53 = vld [vmem:[%s2633_s4] sm:$0xff]  ;;  %s2151_s21 = smov 12   ;;  %vm779_vm4 = vcmask 97280   ;;  %vm966_vm5 = vcmask 1043456  }
  0x1e   : > { %s357_s26 = scalar_lea.vmem %s2629_s0, %s1743_s22  ;;  %1903 = vmatprep.subr.mxu1 %v789_v50  ;;  %s346_s20 = sand.u32 1, %s2122_s28  }
  0x1f   : > { %v375_v2 = vld [vmem:[%s357_s26] sm:$0xff]  ;;  %s362_s2 = scalar_select %p361_p0, %s2130_s30, 3  ;;  %v376_v3 = vld [vmem:[%s357_s26 + $0x8] sm:$0xff]  ;;  %v377_v4 = vld [vmem:[%s357_s26 + $0x10] sm:$0xff] }
  0x20   : > { %1884 = vmatprep.mubr.msk.f32.mxu0 %vm389_vm0, %v375_v2  ;;  %v378_v5 = vld [vmem:[%s357_s26 + $0x18] sm:$0xff]  ;;  %v379_v6 = vld [vmem:[%s357_s26 + $0x20] sm:$0xff]  ;;  %v380_v9 = vld [vmem:[%s357_s26 + $0x28] sm:$0xff] }
  0x21   : > { %s1744_s16 = sshll.u32 %s362_s2, 1  ;;  %1885 = vmatmul.mubr.msk.f32.vlgmr.msra.gmra.mxu0 %vm389_vm0, %v376_v3  ;;  %v381_v10 = vld [vmem:[%s357_s26 + $0x30] sm:$0xff]  ;;  %v382_v11 = vld [vmem:[%s357_s26 + $0x38] sm:$0xff]  ;;  %s2154_s26 = smov 120  }
  0x22   : > { %s365_s15 = sadd.s32 %s1745_s13, %s1744_s16  ;;  %1887 = vmatprep.mubr.msk.f32.mxu0 %vm389_vm0, %v377_v4  ;;  %s1819_s2 = sshll.u32 %s2130_s30, 4 }
  0x23   : > { %s1746_s14 = sshll.u32 %s365_s15, 3  ;;  %s1815_s15 = sshll.u32 %s2134_s9, 6 }
  0x24   : > { %s367_s17 = scalar_lea.vmem %s2630_s1, %s1746_s14  ;;  %s2577_s13 = scalar_lea.sflag [#allocation4], %s346_s20 }
  0x25   : > { %v536_v7 = vld [vmem:[%s367_s17] sm:$0xff]  ;;  %v537_v8 = vld [vmem:[%s367_s17 + $0x8] sm:$0xff]  ;;  %1888 = vmatmul.mubr.msk.f32.gmra.mxu0 %vm389_vm0, %v378_v5  ;;  %s370_s16 = scalar_select %p361_p0, 1, 0 }
  0x26   : > { %1900 = vmatprep.mubr.msk.f32.mxu1 %vm389_vm0, %v536_v7  ;;  %1890 = vmatprep.mubr.msk.f32.mxu0 %vm389_vm0, %v379_v6 }
  0x27   : > { %1901 = vmatmul.mubr.msk.f32.vlgmr.msra.gmra.mxu1 %vm389_vm0, %v537_v8  ;;  %s371_s22 = scvt.s32.f32 %s370_s16  ;;  %s1629_s16 = sadd.s32 %s1819_s2, %s1815_s15 }
  0x28   : > { %1904 = vmatpush3.msra.mxu1 %v789_v50  ;;  %s1816_s30 = sshll.u32 %s1629_s16, 7 }
  0x29   : > { %1891 = vmatmul.mubr.msk.f32.gmra.mxu0 %vm389_vm0, %v380_v9  ;;  %v621_v27 = vstv %s371_s22  ;;  %1905 = vmatprep.subr.mxu1 %v788_v53  ;;  %s2152_s22 = smov 124  }
  0x2a   : > { %1893 = vmatprep.mubr.msk.f32.mxu0 %vm389_vm0, %v381_v10  ;;  %1906 = vmatpush3.msra.mxu1 %v788_v53  ;;  %v2398_v53 = vld [vmem:[%s2635_s6] sm:$0xf] }
  0x2b   : > { %1919 = vmatprep.subr.msk.mxu0 %vm966_vm5, %v2398_v53  ;;  %1933 = vmatprep.subr.msk.mxu1 %vm966_vm5, %v2398_v53 }
  0x2c   : > { %1920 = vmatpush3.msk.msra.mxu0 %vm966_vm5, %v2398_v53 }
  0x2d   : > { %1894 = vmatmul.mubr.msk.f32.gmra.mxu0 %vm389_vm0, %v382_v11  ;;  %1947 = vmatprep.subr.msk.mxu0 %vm966_vm5, %v2398_v53 }
  0xe1   : > { %v1886_v14 = vpop.f32.mrf.mxu0 }
  0xe2   : > { %v486_v15 = vadd.f32 %v1886_v14, %v1747_v13 }
  0xe3   : > { %v480_v16 = vpop.f32.mrf.mxu0 }
  0xe4   : > { %v520_v17 = vmax.f32 %v486_v15, 0.0  ;;  %v481_v18 = vadd.f32 %v1747_v13, %v480_v16 }
  0xe5   : > { %v1889_v19 = vpop.f32.mrf.mxu0 }
  0xe6   : > { %529 = vst.msk [vmem:[#allocation2 + $0x8] sm:$0xff] %vm527_vm2, %v520_v17  ;;  %v519_v20 = vmax.f32 %v481_v18, 0.0  ;;  %v496_v21 = vadd.f32 %v1889_v19, %v1747_v13 }
  0xe7   : > { %v1902_v22 = vpop.f32.mrf.mxu1  ;;  %v490_v23 = vpop.f32.mrf.mxu0 }
  0xe8   : > { %v616_v24 = vadd.f32 %v1902_v22, %v1747_v13  ;;  %528 = vst.msk [vmem:[#allocation2] sm:$0xff] %vm527_vm2, %v519_v20  ;;  %v522_v25 = vmax.f32 %v496_v21, 0.0  ;;  %v491_v26 = vadd.f32 %v1747_v13, %v490_v23 }
  0xe9   : > { %v610_v28 = vpop.f32.mrf.mxu1  ;;  %v1892_v29 = vpop.f32.mrf.mxu0 }
  0xea   : > { %v620_v30 = vmax.f32 %v616_v24, 0.0  ;;  %v611_v31 = vadd.f32 %v1747_v13, %v610_v28  ;;  %531 = vst.msk [vmem:[#allocation2 + $0x20] sm:$0xff] %vm527_vm2, %v522_v25  ;;  %v521_v32 = vmax.f32 %v491_v26, 0.0  ;;  %v506_v33 = vadd.f32 %v1892_v29, %v1747_v13 }
  0xeb   : > { %v500_v34 = vpop.f32.mrf.mxu0 }
  0xec   : > { %v623_v35 = vmul.f32 %v621_v27, %v620_v30  ;;  %v619_v36 = vmax.f32 %v611_v31, 0.0  ;;  %530 = vst.msk [vmem:[#allocation2 + $0x18] sm:$0xff] %vm527_vm2, %v521_v32  ;;  %v524_v37 = vmax.f32 %v506_v33, 0.0  ;;  %v501_v38 = vadd.f32 %v1747_v13, %v500_v34 }
  0xed   : > { %v642_v39 = vld [vmem:[#allocation2 + $0x9] sm:$0xff]  ;;  %v1895_v40 = vpop.f32.mrf.mxu0 }
  0xee   : > { %626 = vst.msk [vmem:[#allocation2 + $0x68] sm:$0xff] %vm527_vm2, %v623_v35  ;;  %v622_v41 = vmul.f32 %v621_v27, %v619_v36  ;;  %676 = vrot.lane.b32.xlu0 %v642_v39, %s2149_s24  ;;  %533 = vst.msk [vmem:[#allocation2 + $0x38] sm:$0xff] %vm527_vm2, %v524_v37  ;;  %v523_v42 = vmax.f32 %v501_v38, 0.0  ;;  %v516_v43 = vadd.f32 %v1895_v40, %v1747_v13  ;;  %v634_v14 = vld [vmem:[#allocation2 + $0x8] sm:$0xff] }
  0xef   : > { %v510_v44 = vpop.f32.mrf.mxu0  ;;  %v641_v47 = vld [vmem:[#allocation2 + $0x1] sm:$0xff] }
  0xf0   : > { %625 = vst.msk [vmem:[#allocation2 + $0x60] sm:$0xff] %vm527_vm2, %v622_v41  ;;  %532 = vst.msk [vmem:[#allocation2 + $0x30] sm:$0xff] %vm527_vm2, %v523_v42  ;;  %v526_v45 = vmax.f32 %v516_v43, 0.0  ;;  %v511_v46 = vadd.f32 %v1747_v13, %v510_v44  ;;  %v633_v13 = vld [vmem:[#allocation2] sm:$0xff] }
  0xf1   : > { %v2323_v51 = vld [vmem:[#allocation2 + $0x20] sm:$0xff] }
  0xf2   : > { %674 = vrot.lane.b32.xlu0 %v641_v47, %s2149_s24  ;;  %535 = vst.msk [vmem:[#allocation2 + $0x50] sm:$0xff] %vm527_vm2, %v526_v45  ;;  %v525_v48 = vmax.f32 %v511_v46, 0.0  ;;  %v659_v55 = vld [vmem:[#allocation2 + $0x21] sm:$0xff] }
  0xf3   : > { %v658_v54 = vld [vmem:[#allocation2 + $0x19] sm:$0xff] }
  0xf4   : > { %534 = vst.msk [vmem:[#allocation2 + $0x48] sm:$0xff] %vm527_vm2, %v525_v48  ;;  %v650_v57 = vld [vmem:[#allocation2 + $0x18] sm:$0xff] }
  0xf5   : > { %v657_v49 = vld [vmem:[#allocation2 + $0x68] sm:$0xff]  ;;  %v2341_v59 = vld [vmem:[#allocation2 + $0x38] sm:$0xff] }
  0xf6   : > { %720 = vrot.lane.b32.xlu1 %v657_v49, %s2150_s25  ;;  %v661_v60 = vld [vmem:[#allocation2 + $0x39] sm:$0xff]  ;;  %v665_v2 = vld [vmem:[#allocation2 + $0x69] sm:$0xff] }
  0xf7   : > { %v656_v52 = vld [vmem:[#allocation2 + $0x60] sm:$0xff]  ;;  %v2334_v56 = vld [vmem:[#allocation2 + $0x30] sm:$0xff] }
  0xf8   : > { %718 = vrot.lane.b32.xlu0 %v656_v52, %s2150_s25  ;;  %v660_v58 = vld [vmem:[#allocation2 + $0x31] sm:$0xff]  ;;  %v664_v1 = vld [vmem:[#allocation2 + $0x61] sm:$0xff] }
  0xf9   : > { %v2350_v63 = vld [vmem:[#allocation2 + $0x50] sm:$0xff] }
  0xfa   : > { %708 = vrot.lane.b32.xlu1 %v2323_v51, %s2150_s25  ;;  %v663_v0 = vld [vmem:[#allocation2 + $0x51] sm:$0xff] }
  0xfb   : > { %v654_v61 = vld [vmem:[#allocation2 + $0x48] sm:$0xff] }
  0xfc   : > { %738 = vrot.lane.b32.xlu0 %v658_v54, %s2151_s21  ;;  %v662_v62 = vld [vmem:[#allocation2 + $0x49] sm:$0xff] }
  0xfe   : > { %740 = vrot.lane.b32.xlu1 %v659_v55, %s2151_s21 }
 0x100   : > { %678 = vrot.lane.b32.xlu0 %v658_v54, %s2149_s24  ;;  %v1758_v54 = vld [vmem:[%s2634_s5] ss:$0 sm:$0xff] }
 0x102   : > { %680 = vrot.lane.b32.xlu1 %v659_v55, %s2149_s24 }
 0x104   : > { %710 = vrot.lane.b32.xlu0 %v2334_v56, %s2150_s25 }
 0x106   : > { %706 = vrot.lane.b32.xlu1 %v650_v57, %s2150_s25 }
 0x108   : > { %742 = vrot.lane.b32.xlu0 %v660_v58, %s2151_s21 }
 0x10a   : > { %712 = vrot.lane.b32.xlu1 %v2341_v59, %s2150_s25 }
 0x10c   : > { %682 = vrot.lane.b32.xlu0 %v660_v58, %s2149_s24 }
 0x10e   : > { %744 = vrot.lane.b32.xlu1 %v661_v60, %s2151_s21 }
 0x110   : > { %714 = vrot.lane.b32.xlu0 %v654_v61, %s2150_s25 }
 0x112   : > { %684 = vrot.lane.b32.xlu1 %v661_v60, %s2149_s24 }
 0x114   : > { %746 = vrot.lane.b32.xlu0 %v662_v62, %s2151_s21 }
 0x116   : > { %716 = vrot.lane.b32.xlu1 %v2350_v63, %s2150_s25 }
 0x118   : > { %686 = vrot.lane.b32.xlu0 %v662_v62, %s2149_s24 }
 0x11a   : > { %748 = vrot.lane.b32.xlu1 %v663_v0, %s2151_s21 }
 0x11c   : > { %750 = vrot.lane.b32.xlu0 %v664_v1, %s2151_s21 }
 0x11e   : > { %688 = vrot.lane.b32.xlu1 %v663_v0, %s2149_s24  ;;  %s2153_s24 = smov 116  }
 0x122   : > { %752 = vrot.lane.b32.xlu1 %v665_v2, %s2151_s21  ;;  %s1740_s21 = sshll.u32 %s346_s20, 7 }
 0x123   : > { %s2503_s17 = scalar_lea.vmem [#allocation3], %s1740_s21  ;;  %s2155_s21 = smov [#allocation3]  }
 0x124   : > { %s1632_s9 = sshll.u32 %s2503_s17, 4  ;;  %s2058_s2 = sshll.u32 %s2155_s21, 4  ;;  %s2570_s9 = int_to_ptr.vmem [resolvable:$true] %s1632_s9  ;;  %s2059_s2 = int_to_ptr.vmem [resolvable:$false] %s2058_s2 }
 0x125   : > { %s2054_s14 = scalar_lea.vmem %s2570_s9, 2048  ;;  %s2060_s15 = scalar_lea.vmem %s2059_s2, 4096 }
 0x126   : > { %p2055_p1 = scmp.ne.s32.totalorder %s2570_s9, %s2054_s14  ;;  %p2061_p5 = scmp.lt.s32.totalorder %s2570_s9, %s2059_s2 }
 0x127   : > { %p2062_p6 = scmp.lt.s32.totalorder %s2060_s15, %s2054_s14 }
 0x128   : > { %p2056_p2 = pnand %p2055_p1, %p2253_p3 }
 0x129   : > { %p2063_p7 = por %p2062_p6, %p2061_p5 }
 0x12a   : > { %p2057_p4 = pneg %p2056_p2 }
 0x12c   : > { %p2064_p9 = pnand %p2063_p7, %p2057_p4 }
 0x160   : > { %v677_v3 = vpop.permute.xlu0 %676 }
 0x161   : > { %v763_v17 = vsel %vm527_vm2, %v634_v14, %v677_v3 }
 0x164   : > { %v675_v4 = vpop.permute.xlu0 %674 }
 0x165   : > { %v762_v15 = vsel %vm527_vm2, %v633_v13, %v675_v4 }
 0x168   : > { %v721_v5 = vpop.permute.xlu1 %720 }
 0x16a   : > { %v719_v6 = vpop.permute.xlu0 %718 }
 0x16c   : > { %v709_v7 = vpop.permute.xlu1 %708 }
 0x16d   : > { %v772_v20 = vsel %vm770_vm3, %v763_v17, %v709_v7 }
 0x16e   : > { %v739_v8 = vpop.permute.xlu0 %738 }
 0x170   : > { %v741_v9 = vpop.permute.xlu1 %740 }
 0x171   : > { %v781_v24 = vsel %vm779_vm4, %v772_v20, %v741_v9 }
 0x172   : > { %v679_v10 = vpop.permute.xlu0 %678 }
 0x173   : > { %v764_v18 = vsel %vm527_vm2, %v650_v57, %v679_v10 }
 0x174   : > { %v681_v11 = vpop.permute.xlu1 %680 }
 0x175   : > { %v765_v28 = vsel %vm527_vm2, %v2323_v51, %v681_v11 }
 0x176   : > { %v711_v12 = vpop.permute.xlu0 %710 }
 0x177   : > { %v773_v21 = vsel %vm770_vm3, %v764_v18, %v711_v12 }
 0x178   : > { %v707_v16 = vpop.permute.xlu1 %706 }
 0x179   : > { %v771_v19 = vsel %vm770_vm3, %v762_v15, %v707_v16 }
 0x17a   : > { %v780_v22 = vsel %vm779_vm4, %v771_v19, %v739_v8  ;;  %v743_v23 = vpop.permute.xlu0 %742 }
 0x17b   : > { %1907 = vmatprep.mubr.msk.f32.mxu1 %vm389_vm0, %v780_v22  ;;  %v782_v25 = vsel %vm779_vm4, %v773_v21, %v743_v23 }
 0x17c   : > { %v713_v26 = vpop.permute.xlu1 %712  ;;  %1908 = vmatmul.mubr.msk.f32.vlgmr.msra.gmra.mxu1 %vm389_vm0, %v781_v24 }
 0x17d   : > { %1910 = vmatprep.mubr.msk.f32.mxu1 %vm389_vm0, %v782_v25  ;;  %v774_v29 = vsel %vm770_vm3, %v765_v28, %v713_v26  ;;  %1934 = vmatpush3.msk.msra.mxu1 %vm966_vm5, %v2398_v53 }
 0x17e   : > { %v683_v27 = vpop.permute.xlu0 %682  ;;  %1961 = vmatprep.subr.msk.mxu1 %vm966_vm5, %v2398_v53 }
 0x17f   : > { %v766_v34 = vsel %vm527_vm2, %v2334_v56, %v683_v27 }
 0x180   : > { %v745_v30 = vpop.permute.xlu1 %744 }
 0x181   : > { %v783_v31 = vsel %vm779_vm4, %v774_v29, %v745_v30 }
 0x182   : > { %1911 = vmatmul.mubr.msk.f32.gmra.mxu1 %vm389_vm0, %v783_v31  ;;  %v715_v32 = vpop.permute.xlu0 %714 }
 0x183   : > { %v775_v35 = vsel %vm770_vm3, %v766_v34, %v715_v32 }
 0x184   : > { %v685_v33 = vpop.permute.xlu1 %684 }
 0x185   : > { %v767_v40 = vsel %vm527_vm2, %v2341_v59, %v685_v33 }
 0x186   : > { %v747_v36 = vpop.permute.xlu0 %746 }
 0x187   : > { %v784_v37 = vsel %vm779_vm4, %v775_v35, %v747_v36 }
 0x188   : > { %v717_v38 = vpop.permute.xlu1 %716  ;;  %1913 = vmatprep.mubr.msk.f32.mxu1 %vm389_vm0, %v784_v37 }
 0x189   : > { %v776_v42 = vsel %vm770_vm3, %v767_v40, %v717_v38 }
 0x18a   : > { %v687_v39 = vpop.permute.xlu0 %686 }
 0x18b   : > { %v768_v41 = vsel %vm527_vm2, %v654_v61, %v687_v39  ;;  %v2462_v39 = vld [vmem:[%s2636_s7] ss:$0 sm:$0xff] }
 0x18c   : > { %v749_v43 = vpop.permute.xlu1 %748  ;;  %v777_v45 = vsel %vm770_vm3, %v768_v41, %v719_v6 }
 0x18d   : > { %v785_v44 = vsel %vm779_vm4, %v776_v42, %v749_v43 }
 0x18e   : > { %1914 = vmatmul.mubr.msk.f32.gmra.mxu1 %vm389_vm0, %v785_v44  ;;  %v751_v46 = vpop.permute.xlu0 %750 }
 0x18f   : > { %v786_v47 = vsel %vm779_vm4, %v777_v45, %v751_v46 }
 0x190   : > { %v689_v48 = vpop.permute.xlu1 %688  ;;  %1916 = vmatprep.mubr.msk.f32.mxu1 %vm389_vm0, %v786_v47 }
 0x191   : > { %v769_v49 = vsel %vm527_vm2, %v2350_v63, %v689_v48 }
 0x192   : > { %v778_v50 = vsel %vm770_vm3, %v769_v49, %v721_v5 }
 0x194   : > { %v753_v51 = vpop.permute.xlu1 %752 }
 0x195   : > { %v787_v52 = vsel %vm779_vm4, %v778_v50, %v753_v51 }
 0x196   : > { %1917 = vmatmul.mubr.msk.f32.gmra.mxu1 %vm389_vm0, %v787_v52 }
 0x23c   : > { %v1909_v55 = vpop.f32.mrf.mxu1 }
 0x23d   : > { %v893_v56 = vadd.f32 %v1909_v55, %v1758_v54 }
 0x23e   : > { %v887_v57 = vpop.f32.mrf.mxu1 }
 0x23f   : > { %v927_v58 = vmax.f32 %v893_v56, 0.0  ;;  %v888_v59 = vadd.f32 %v1758_v54, %v887_v57 }
 0x241   : > { %v926_v60 = vmax.f32 %v888_v59, 0.0  ;;  %1085 = vrot.lane.b32.xlu1 %v927_v58, %s2152_s22 }
 0x242   : > { %v1912_v61 = vpop.f32.mrf.mxu1 }
 0x243   : > { %v903_v62 = vadd.f32 %v1912_v61, %v1758_v54  ;;  %1083 = vrot.lane.b32.xlu0 %v926_v60, %s2152_s22  ;;  %1921 = vmatprep.mubr.msk.f32.mxu0 %vm527_vm2, %v926_v60 }
 0x244   : > { %v897_v63 = vpop.f32.mrf.mxu1  ;;  %1922 = vmatmul.mubr.msk.f32.vlgmr.msra.gmra.mxu0 %vm527_vm2, %v927_v58 }
 0x245   : > { %v929_v0 = vmax.f32 %v903_v62, 0.0  ;;  %v898_v1 = vadd.f32 %v1758_v54, %v897_v63  ;;  %1948 = vmatpush3.msk.msra.mxu0 %vm966_vm5, %v2398_v53 }
 0x247   : > { %v928_v2 = vmax.f32 %v898_v1, 0.0  ;;  %1089 = vrot.lane.b32.xlu1 %v929_v0, %s2152_s22 }
 0x249   : > { %1087 = vrot.lane.b32.xlu0 %v928_v2, %s2152_s22  ;;  %1924 = vmatprep.mubr.msk.f32.mxu0 %vm527_vm2, %v928_v2 }
 0x24a   : > { %1925 = vmatmul.mubr.msk.f32.gmra.mxu0 %vm527_vm2, %v929_v0 }
 0x24e   : > { %v1915_v3 = vpop.f32.mrf.mxu1 }
 0x24f   : > { %v913_v4 = vadd.f32 %v1915_v3, %v1758_v54 }
 0x250   : > { %v907_v5 = vpop.f32.mrf.mxu1 }
 0x251   : > { %v931_v6 = vmax.f32 %v913_v4, 0.0  ;;  %v908_v7 = vadd.f32 %v1758_v54, %v907_v5 }
 0x253   : > { %v930_v8 = vmax.f32 %v908_v7, 0.0  ;;  %1093 = vrot.lane.b32.xlu1 %v931_v6, %s2152_s22 }
 0x255   : > { %1091 = vrot.lane.b32.xlu0 %v930_v8, %s2152_s22  ;;  %1927 = vmatprep.mubr.msk.f32.mxu0 %vm527_vm2, %v930_v8 }
 0x256   : > { %v1918_v9 = vpop.f32.mrf.mxu1  ;;  %1928 = vmatmul.mubr.msk.f32.gmra.mxu0 %vm527_vm2, %v931_v6 }
 0x257   : > { %v923_v10 = vadd.f32 %v1918_v9, %v1758_v54 }
 0x258   : > { %v917_v11 = vpop.f32.mrf.mxu1 }
 0x259   : > { %v933_v12 = vmax.f32 %v923_v10, 0.0  ;;  %v918_v13 = vadd.f32 %v1758_v54, %v917_v11 }
 0x25b   : > { %v932_v14 = vmax.f32 %v918_v13, 0.0  ;;  %1097 = vrot.lane.b32.xlu1 %v933_v12, %s2152_s22 }
 0x25d   : > { %1095 = vrot.lane.b32.xlu0 %v932_v14, %s2152_s22  ;;  %1930 = vmatprep.mubr.msk.f32.mxu0 %vm527_vm2, %v932_v14 }
 0x25e   : > { %1931 = vmatmul.mubr.msk.f32.gmra.mxu0 %vm527_vm2, %v933_v12 }
 0x25f   : > { %1375 = vrot.lane.b32.xlu1 %v927_v58, %s2153_s24 }
 0x261   : > { %1373 = vrot.lane.b32.xlu0 %v926_v60, %s2153_s24 }
 0x263   : > { %1379 = vrot.lane.b32.xlu1 %v929_v0, %s2153_s24 }
 0x265   : > { %1377 = vrot.lane.b32.xlu0 %v928_v2, %s2153_s24 }
 0x267   : > { %1383 = vrot.lane.b32.xlu1 %v931_v6, %s2153_s24 }
 0x269   : > { %1381 = vrot.lane.b32.xlu0 %v930_v8, %s2153_s24 }
 0x26b   : > { %1387 = vrot.lane.b32.xlu1 %v933_v12, %s2153_s24 }
 0x26d   : > { %1385 = vrot.lane.b32.xlu0 %v932_v14, %s2153_s24 }
 0x26f   : > { %1230 = vrot.lane.b32.xlu1 %v927_v58, %s2154_s26 }
 0x271   : > { %1228 = vrot.lane.b32.xlu0 %v926_v60, %s2154_s26 }
 0x273   : > { %1234 = vrot.lane.b32.xlu1 %v929_v0, %s2154_s26 }
 0x275   : > { %1232 = vrot.lane.b32.xlu0 %v928_v2, %s2154_s26 }
 0x277   : > { %1238 = vrot.lane.b32.xlu1 %v931_v6, %s2154_s26 }
 0x279   : > { %1236 = vrot.lane.b32.xlu0 %v930_v8, %s2154_s26 }
 0x27b   : > { %1242 = vrot.lane.b32.xlu1 %v933_v12, %s2154_s26 }
 0x27d   : > { %1240 = vrot.lane.b32.xlu0 %v932_v14, %s2154_s26  ;;  %s2566_s26 = scalar_lea.hbm %s2637_s8, %s1816_s30 }
 0x2b3   : > { %v1086_v16 = vpop.permute.xlu1 %1085 }
 0x2b5   : > { %v1084_v15 = vpop.permute.xlu0 %1083 }
 0x2b6   : > { %1935 = vmatprep.mubr.msk.f32.mxu1 %vm527_vm2, %v1084_v15 }
 0x2b7   : > { %1936 = vmatmul.mubr.msk.f32.vlgmr.msra.gmra.mxu1 %vm527_vm2, %v1086_v16 }
 0x2b8   : > { %1962 = vmatpush3.msk.msra.mxu1 %vm966_vm5, %v2398_v53 }
 0x2b9   : > { %v1090_v18 = vpop.permute.xlu1 %1089 }
 0x2bb   : > { %v1088_v17 = vpop.permute.xlu0 %1087 }
 0x2bc   : > { %1938 = vmatprep.mubr.msk.f32.mxu1 %vm527_vm2, %v1088_v17 }
 0x2bd   : > { %1939 = vmatmul.mubr.msk.f32.gmra.mxu1 %vm527_vm2, %v1090_v18 }
 0x2c5   : > { %v1094_v20 = vpop.permute.xlu1 %1093 }
 0x2c7   : > { %v1092_v19 = vpop.permute.xlu0 %1091 }
 0x2c8   : > { %1941 = vmatprep.mubr.msk.f32.mxu1 %vm527_vm2, %v1092_v19 }
 0x2c9   : > { %1942 = vmatmul.mubr.msk.f32.gmra.mxu1 %vm527_vm2, %v1094_v20 }
 0x2cd   : > { %v1098_v21 = vpop.permute.xlu1 %1097 }
 0x2cf   : > { %v1096_v22 = vpop.permute.xlu0 %1095 }
 0x2d0   : > { %1944 = vmatprep.mubr.msk.f32.mxu1 %vm527_vm2, %v1096_v22 }
 0x2d1   : > { %v1376_v23 = vpop.permute.xlu1 %1375  ;;  %1945 = vmatmul.mubr.msk.f32.gmra.mxu1 %vm527_vm2, %v1098_v21 }
 0x2d3   : > { %v1374_v24 = vpop.permute.xlu0 %1373 }
 0x2d4   : > { %1963 = vmatprep.mubr.msk.f32.mxu1 %vm527_vm2, %v1374_v24 }
 0x2d5   : > { %v1380_v25 = vpop.permute.xlu1 %1379  ;;  %1964 = vmatmul.mubr.msk.f32.vlgmr.msra.gmra.mxu1 %vm527_vm2, %v1376_v23 }
 0x2d7   : > { %v1378_v26 = vpop.permute.xlu0 %1377 }
 0x2d8   : > { %1966 = vmatprep.mubr.msk.f32.mxu1 %vm527_vm2, %v1378_v26 }
 0x2d9   : > { %v1384_v27 = vpop.permute.xlu1 %1383  ;;  %1967 = vmatmul.mubr.msk.f32.gmra.mxu1 %vm527_vm2, %v1380_v25 }
 0x2db   : > { %v1382_v28 = vpop.permute.xlu0 %1381 }
 0x2dc   : > { %1969 = vmatprep.mubr.msk.f32.mxu1 %vm527_vm2, %v1382_v28 }
 0x2dd   : > { %v1388_v29 = vpop.permute.xlu1 %1387  ;;  %1970 = vmatmul.mubr.msk.f32.gmra.mxu1 %vm527_vm2, %v1384_v27 }
 0x2df   : > { %v1386_v30 = vpop.permute.xlu0 %1385 }
 0x2e0   : > { %1972 = vmatprep.mubr.msk.f32.mxu1 %vm527_vm2, %v1386_v30 }
 0x2e1   : > { %v1231_v31 = vpop.permute.xlu1 %1230  ;;  %1973 = vmatmul.mubr.msk.f32.gmra.mxu1 %vm527_vm2, %v1388_v29 }
 0x2e3   : > { %v1229_v32 = vpop.permute.xlu0 %1228 }
 0x2e4   : > { %1949 = vmatprep.mubr.msk.f32.mxu0 %vm527_vm2, %v1229_v32 }
 0x2e5   : > { %v1235_v33 = vpop.permute.xlu1 %1234  ;;  %1950 = vmatmul.mubr.msk.f32.vlgmr.msra.gmra.mxu0 %vm527_vm2, %v1231_v31 }
 0x2e7   : > { %v1233_v34 = vpop.permute.xlu0 %1232 }
 0x2e8   : > { %1952 = vmatprep.mubr.msk.f32.mxu0 %vm527_vm2, %v1233_v34 }
 0x2e9   : > { %1953 = vmatmul.mubr.msk.f32.gmra.mxu0 %vm527_vm2, %v1235_v33  ;;  %v1239_v35 = vpop.permute.xlu1 %1238 }
 0x2eb   : > { %v1237_v36 = vpop.permute.xlu0 %1236 }
 0x2ec   : > { %1955 = vmatprep.mubr.msk.f32.mxu0 %vm527_vm2, %v1237_v36 }
 0x2ed   : > { %1956 = vmatmul.mubr.msk.f32.gmra.mxu0 %vm527_vm2, %v1239_v35  ;;  %v1243_v38 = vpop.permute.xlu1 %1242 }
 0x2ef   : > { %v1241_v37 = vpop.permute.xlu0 %1240 }
 0x2f0   : > { %1958 = vmatprep.mubr.msk.f32.mxu0 %vm527_vm2, %v1241_v37 }
 0x2f1   : > { %1959 = vmatmul.mubr.msk.f32.gmra.mxu0 %vm527_vm2, %v1243_v38 }
 0x304   : > { %v1923_v24 = vpop.f32.mrf.mxu0 }
 0x305   : > { %v1042_v28 = vadd.f32 %v1923_v24, %v2462_v39 }
 0x306   : > { %v1036_v25 = vpop.f32.mrf.mxu0 }
 0x307   : > { %v1037_v30 = vadd.f32 %v2462_v39, %v1036_v25  ;;  %v1076_v31 = vmax.f32 %v1042_v28, 0.0 }
 0x309   : > { %v1075_v34 = vmax.f32 %v1037_v30, 0.0 }
 0x30a   : > { %v1926_v26 = vpop.f32.mrf.mxu0 }
 0x30b   : > { %v1052_v35 = vadd.f32 %v1926_v26, %v2462_v39 }
 0x30c   : > { %v1046_v27 = vpop.f32.mrf.mxu0 }
 0x316   : > { %v1929_v29 = vpop.f32.mrf.mxu0 }
 0x318   : > { %v1056_v32 = vpop.f32.mrf.mxu0 }
 0x31e   : > { %v1932_v37 = vpop.f32.mrf.mxu0 }
 0x377   : > { %v1937_v40 = vpop.f32.mrf.mxu1 }
 0x378   : > { %v1187_v41 = vadd.f32 %v1937_v40, %v2462_v39  ;;  %v1047_v40 = vadd.f32 %v2462_v39, %v1046_v27 }
 0x379   : > { %v1181_v42 = vpop.f32.mrf.mxu1 }
 0x37a   : > { %v1221_v43 = vmax.f32 %v1187_v41, 0.0  ;;  %v1182_v44 = vadd.f32 %v2462_v39, %v1181_v42  ;;  %v1078_v42 = vmax.f32 %v1052_v35, 0.0 }
 0x37c   : > { %v1220_v45 = vmax.f32 %v1182_v44, 0.0  ;;  %1528 = vrot.lane.b32.xlu1 %v1221_v43, %s2150_s25  ;;  %v1066_v43 = vpop.f32.mrf.mxu0 }
 0x37d   : > { %v1940_v46 = vpop.f32.mrf.mxu1 }
 0x37e   : > { %v1197_v47 = vadd.f32 %v1940_v46, %v2462_v39  ;;  %1526 = vrot.lane.b32.xlu0 %v1220_v45, %s2150_s25  ;;  %v1077_v45 = vmax.f32 %v1047_v40, 0.0 }
 0x37f   : > { %v1191_v48 = vpop.f32.mrf.mxu1 }
 0x380   : > { %v1223_v49 = vmax.f32 %v1197_v47, 0.0  ;;  %v1192_v50 = vadd.f32 %v2462_v39, %v1191_v48 }
 0x382   : > { %v1222_v51 = vmax.f32 %v1192_v50, 0.0  ;;  %1532 = vrot.lane.b32.xlu1 %v1223_v49, %s2150_s25 }
 0x384   : > { %1530 = vrot.lane.b32.xlu0 %v1222_v51, %s2150_s25  ;;  %v1062_v51 = vadd.f32 %v1929_v29, %v2462_v39 }
 0x389   : > { %v1943_v52 = vpop.f32.mrf.mxu1 }
 0x38a   : > { %v1207_v53 = vadd.f32 %v1943_v52, %v2462_v39  ;;  %v1057_v52 = vadd.f32 %v2462_v39, %v1056_v32 }
 0x38b   : > { %v1201_v54 = vpop.f32.mrf.mxu1 }
 0x38c   : > { %v1225_v55 = vmax.f32 %v1207_v53, 0.0  ;;  %v1202_v56 = vadd.f32 %v2462_v39, %v1201_v54  ;;  %v1080_v54 = vmax.f32 %v1062_v51, 0.0 }
 0x38e   : > { %v1224_v57 = vmax.f32 %v1202_v56, 0.0  ;;  %1536 = vrot.lane.b32.xlu1 %v1225_v55, %s2150_s25  ;;  %v1079_v56 = vmax.f32 %v1057_v52, 0.0 }
 0x390   : > { %1534 = vrot.lane.b32.xlu0 %v1224_v57, %s2150_s25 }
 0x391   : > { %v1946_v58 = vpop.f32.mrf.mxu1 }
 0x392   : > { %v1217_v59 = vadd.f32 %v1946_v58, %v2462_v39 }
 0x393   : > { %v1211_v60 = vpop.f32.mrf.mxu1 }
 0x394   : > { %v1227_v61 = vmax.f32 %v1217_v59, 0.0  ;;  %v1212_v62 = vadd.f32 %v2462_v39, %v1211_v60  ;;  %v1072_v60 = vadd.f32 %v1932_v37, %v2462_v39 }
 0x395   : > { %v1965_v63 = vpop.f32.mrf.mxu1 }
 0x396   : > { %v1226_v0 = vmax.f32 %v1212_v62, 0.0  ;;  %v1477_v1 = vadd.f32 %v1965_v63, %v2462_v39  ;;  %1540 = vrot.lane.b32.xlu1 %v1227_v61, %s2150_s25  ;;  %v1067_v62 = vadd.f32 %v2462_v39, %v1066_v43 }
 0x397   : > { %v1471_v2 = vpop.f32.mrf.mxu1 }
 0x398   : > { %v1511_v3 = vmax.f32 %v1477_v1, 0.0  ;;  %v1472_v4 = vadd.f32 %v2462_v39, %v1471_v2  ;;  %1538 = vrot.lane.b32.xlu0 %v1226_v0, %s2150_s25  ;;  %v1082_v0 = vmax.f32 %v1072_v60, 0.0 }
 0x399   : > { %v1968_v5 = vpop.f32.mrf.mxu1 }
 0x39a   : > { %v1510_v6 = vmax.f32 %v1472_v4, 0.0  ;;  %v1487_v7 = vadd.f32 %v1968_v5, %v2462_v39  ;;  %1568 = vrot.lane.b32.xlu1 %v1511_v3, %s2150_s25  ;;  %v1081_v3 = vmax.f32 %v1067_v62, 0.0 }
 0x39b   : > { %v1481_v8 = vpop.f32.mrf.mxu1 }
 0x39c   : > { %v1513_v9 = vmax.f32 %v1487_v7, 0.0  ;;  %v1482_v10 = vadd.f32 %v2462_v39, %v1481_v8  ;;  %1566 = vrot.lane.b32.xlu0 %v1510_v6, %s2150_s25 }
 0x39d   : > { %v1971_v11 = vpop.f32.mrf.mxu1 }
 0x39e   : > { %v1512_v12 = vmax.f32 %v1482_v10, 0.0  ;;  %v1497_v13 = vadd.f32 %v1971_v11, %v2462_v39  ;;  %1572 = vrot.lane.b32.xlu1 %v1513_v9, %s2150_s25 }
 0x39f   : > { %v1491_v14 = vpop.f32.mrf.mxu1 }
 0x3a0   : > { %v1515_v15 = vmax.f32 %v1497_v13, 0.0  ;;  %v1492_v16 = vadd.f32 %v2462_v39, %v1491_v14  ;;  %1570 = vrot.lane.b32.xlu0 %v1512_v12, %s2150_s25 }
 0x3a1   : > { %v1974_v17 = vpop.f32.mrf.mxu1 }
 0x3a2   : > { %v1514_v18 = vmax.f32 %v1492_v16, 0.0  ;;  %v1507_v19 = vadd.f32 %v1974_v17, %v2462_v39  ;;  %1576 = vrot.lane.b32.xlu1 %v1515_v15, %s2150_s25 }
 0x3a3   : > { %v1501_v20 = vpop.f32.mrf.mxu1 }
 0x3a4   : > { %v1517_v21 = vmax.f32 %v1507_v19, 0.0  ;;  %v1502_v22 = vadd.f32 %v2462_v39, %v1501_v20  ;;  %1574 = vrot.lane.b32.xlu0 %v1514_v18, %s2150_s25 }
 0x3a5   : > { %v1951_v47 = vpop.f32.mrf.mxu0 }
 0x3a6   : > { %v1516_v23 = vmax.f32 %v1502_v22, 0.0  ;;  %1580 = vrot.lane.b32.xlu1 %v1517_v21, %s2150_s25  ;;  %v1332_v1 = vadd.f32 %v1951_v47, %v2462_v39 }
 0x3a7   : > { %v1326_v50 = vpop.f32.mrf.mxu0 }
 0x3a8   : > { %1578 = vrot.lane.b32.xlu0 %v1516_v23, %s2150_s25  ;;  %v1327_v4 = vadd.f32 %v2462_v39, %v1326_v50  ;;  %v1366_v8 = vmax.f32 %v1332_v1, 0.0 }
 0x3a9   : > { %v1954_v53 = vpop.f32.mrf.mxu0 }
 0x3aa   : > { %v1342_v9 = vadd.f32 %v1954_v53, %v2462_v39  ;;  %v1365_v12 = vmax.f32 %v1327_v4, 0.0 }
 0x3ab   : > { %v1336_v58 = vpop.f32.mrf.mxu0 }
 0x3ac   : > { %v1337_v13 = vadd.f32 %v2462_v39, %v1336_v58  ;;  %v1368_v17 = vmax.f32 %v1342_v9, 0.0 }
 0x3ad   : > { %v1957_v63 = vpop.f32.mrf.mxu0 }
 0x3ae   : > { %v1352_v18 = vadd.f32 %v1957_v63, %v2462_v39  ;;  %v1367_v21 = vmax.f32 %v1337_v13, 0.0 }
 0x3af   : > { %v1346_v6 = vpop.f32.mrf.mxu0 }
 0x3b0   : > { %v1347_v22 = vadd.f32 %v2462_v39, %v1346_v6  ;;  %v1370_v26 = vmax.f32 %v1352_v18, 0.0 }
 0x3b1   : > { %v1960_v15 = vpop.f32.mrf.mxu0 }
 0x3b2   : > { %v1362_v27 = vadd.f32 %v1960_v15, %v2462_v39  ;;  %v1369_v30 = vmax.f32 %v1347_v22, 0.0 }
 0x3b3   : > { %v1356_v24 = vpop.f32.mrf.mxu0 }
 0x3ee   : > { %v1529_v33 = vpop.permute.xlu1 %1528 }
 0x3ef   : > { %v1551_v36 = vsel %vm770_vm3, %v1076_v31, %v1529_v33  ;;  %v1357_v31 = vadd.f32 %v2462_v39, %v1356_v24 }
 0x3f0   : > { %1599 = vst.msk [vmem:[%s2503_s17 + $0x8] sm:$0xff] %vm389_vm0, %v1551_v36  ;;  %v1527_v38 = vpop.permute.xlu0 %1526 }
 0x3f1   : > { %v1550_v41 = vsel %vm770_vm3, %v1075_v34, %v1527_v38  ;;  %v1372_v34 = vmax.f32 %v1362_v27, 0.0  ;;  %v1371_v37 = vmax.f32 %v1357_v31, 0.0 }
 0x3f2   : > { %1598 = vst.msk [vmem:[%s2503_s17] sm:$0xff] %vm389_vm0, %v1550_v41 }
 0x3f4   : > { %v1533_v44 = vpop.permute.xlu1 %1532 }
 0x3f5   : > { %v1553_v46 = vsel %vm770_vm3, %v1078_v42, %v1533_v44 }
 0x3f6   : > { %1601 = vst.msk [vmem:[%s2503_s17 + $0x28] sm:$0xff] %vm389_vm0, %v1553_v46  ;;  %v1531_v48 = vpop.permute.xlu0 %1530 }
 0x3f7   : > { %v1552_v49 = vsel %vm770_vm3, %v1077_v45, %v1531_v48 }
 0x3f8   : > { %1600 = vst.msk [vmem:[%s2503_s17 + $0x20] sm:$0xff] %vm389_vm0, %v1552_v49 }
 0x400   : > { %v1537_v55 = vpop.permute.xlu1 %1536 }
 0x401   : > { %v1555_v57 = vsel %vm770_vm3, %v1080_v54, %v1537_v55 }
 0x402   : > { %1603 = vst.msk [vmem:[%s2503_s17 + $0x48] sm:$0xff] %vm389_vm0, %v1555_v57  ;;  %v1535_v59 = vpop.permute.xlu0 %1534 }
 0x403   : > { %v1554_v61 = vsel %vm770_vm3, %v1079_v56, %v1535_v59 }
 0x404   : > { %1602 = vst.msk [vmem:[%s2503_s17 + $0x40] sm:$0xff] %vm389_vm0, %v1554_v61 }
 0x408   : > { %v1541_v2 = vpop.permute.xlu1 %1540 }
 0x409   : > { %v1557_v5 = vsel %vm770_vm3, %v1082_v0, %v1541_v2 }
 0x40a   : > { %1605 = vst.msk [vmem:[%s2503_s17 + $0x68] sm:$0xff] %vm389_vm0, %v1557_v5  ;;  %v1539_v7 = vpop.permute.xlu0 %1538 }
 0x40b   : > { %v1556_v10 = vsel %vm770_vm3, %v1081_v3, %v1539_v7 }
 0x40c   : > { %1604 = vst.msk [vmem:[%s2503_s17 + $0x60] sm:$0xff] %vm389_vm0, %v1556_v10  ;;  %v1569_v11 = vpop.permute.xlu1 %1568 }
 0x40d   : > { %v1591_v14 = vsel %vm770_vm3, %v1366_v8, %v1569_v11 }
 0x40e   : > { %1805 = vst.msk [vmem:[%s2503_s17 + $0x18] sm:$0xff] %vm389_vm0, %v1591_v14  ;;  %v1567_v16 = vpop.permute.xlu0 %1566 }
 0x40f   : > { %v1590_v19 = vsel %vm770_vm3, %v1365_v12, %v1567_v16 }
 0x410   : > { %1804 = vst.msk [vmem:[%s2503_s17 + $0x10] sm:$0xff] %vm389_vm0, %v1590_v19  ;;  %v1573_v20 = vpop.permute.xlu1 %1572 }
 0x411   : > { %v1593_v23 = vsel %vm770_vm3, %v1368_v17, %v1573_v20 }
 0x412   : > { %1807 = vst.msk [vmem:[%s2503_s17 + $0x38] sm:$0xff] %vm389_vm0, %v1593_v23  ;;  %v1571_v25 = vpop.permute.xlu0 %1570 }
 0x413   : > { %v1592_v28 = vsel %vm770_vm3, %v1367_v21, %v1571_v25 }
 0x414   : > { %1806 = vst.msk [vmem:[%s2503_s17 + $0x30] sm:$0xff] %vm389_vm0, %v1592_v28  ;;  %v1577_v29 = vpop.permute.xlu1 %1576 }
 0x415   : > { %v1595_v32 = vsel %vm770_vm3, %v1370_v26, %v1577_v29 }
 0x416   : > { %1809 = vst.msk [vmem:[%s2503_s17 + $0x58] sm:$0xff] %vm389_vm0, %v1595_v32  ;;  %v1575_v33 = vpop.permute.xlu0 %1574 }
 0x417   : > { %v1594_v35 = vsel %vm770_vm3, %v1369_v30, %v1575_v33 }
 0x418   : > { %1808 = vst.msk [vmem:[%s2503_s17 + $0x50] sm:$0xff] %vm389_vm0, %v1594_v35  ;;  %v1581_v36 = vpop.permute.xlu1 %1580 }
 0x419   : > { %v1597_v38 = vsel %vm770_vm3, %v1372_v34, %v1581_v36 }
 0x41a   : > { %1811 = vst.msk [vmem:[%s2503_s17 + $0x78] sm:$0xff] %vm389_vm0, %v1597_v38  ;;  %v1579_v39 = vpop.permute.xlu0 %1578 }
 0x41b   : > { %v1596_v40 = vsel %vm770_vm3, %v1371_v37, %v1579_v39 }
 0x41c   : > { %1810 = vst.msk [vmem:[%s2503_s17 + $0x70] sm:$0xff] %vm389_vm0, %v1596_v40 }
 0x41d   : > { %2067 = shalt.err (!%p2064_p9)
}
 0x41e   : > { %s2068_s20 = scalar_lea.hbm %s2566_s26, 2048  ;;  %s2072_s30 = scalar_lea.hbm %s2637_s8, 16384 }
 0x41f   : > { %p2069_p10 = scmp.ne.s32.totalorder %s2566_s26, %s2068_s20  ;;  %p2073_p13 = scmp.lt.s32.totalorder %s2566_s26, %s2637_s8 }
 0x420   : > { %p2074_p0 = scmp.lt.s32.totalorder %s2072_s30, %s2068_s20 }
 0x421   : > { %p2070_p11 = pnand %p2069_p10, %p2253_p3 }
 0x422   : > { %p2075_p1 = por %p2074_p0, %p2073_p13 }
 0x423   : > { %p2071_p12 = pneg %p2070_p11 }
 0x425   : > { %p2076_p2 = pnand %p2075_p1, %p2071_p12 }
 0x427   : > { %2079 = shalt.err (!%p2076_p2)
}
 0x428   : > { %s2156_s14 = smov 128  }
 0x429   : > { %1975 = dma.vmem_to_hbm [thread:$0]  (%p2253_p3), %s2570_s9, 2048, %s2566_s26, %s2577_s13, %s2156_s14, %s2156_s14, %s2150_s25  }
 0x42a PF: > { %p1981_p4 = scmp.ge.s32.totalorder %s2146_s12, 2  ;;  %s1647_s21 = sand.u32 1, %s2118_s27  }
 0x42b   : > { %s1648_s2 = scalar_lea.sflag [#allocation4], %s1647_s21 }
 0x42c   : > { %p1978_p5 = pnand %p1981_p4, %p2262_p8 }
 0x42e   : > { %p1979_p6 = pneg %p1978_p5 }
 0x430   : > { %2113 = dma.done.wait (%p1979_p6), %s1648_s2, 2048  }
 0x431   : > { %2115 = vsyncadd (%p1979_p6), %s1648_s2, 4294965248  ;;  %s21_s12 = sadd.s32 1, %s2146_s12   ;;  %s2646_s18 = sld [smem:[#allocation6_spill]] }
 0x432   : > { %p18_p7 = scmp.ge.s32.totalorder %s21_s12, 10   ;;  %s2647_s25 = sld [smem:[#allocation7_spill]] }
 0x433   : > { %s2648_s27 = smov %s2122_s28  ;;  %s2649_s28 = smov %s2126_s29 }
 0x434   : > { %s2650_s29 = smov %s2271_s23  ;;  %s2651_s30 = smov %s2138_s10 }
 0x435   : > { %s2652_s9 = smov %s2142_s11  ;;  %20 = sbr.rel (!%p18_p7) target bundleno = 7 (0x7), region = 93 }
 0x437   : > { %s2653_s10 = smov %s2646_s18 }
 0x438   : > { %s2654_s11 = smov %s2647_s25 }
 0x43a   :  { %1653 = vsyncpa [#allocation4], 1 }
 0x43b   :  { %1655 = vsyncpa [#allocation4 + $0x1], 1 }

</bundles_post_ra>
